<compile_context>
chip_gen: v7x
topology: tpu7x:2x2x1
jax: 0.10.0
libtpu: 0.0.40
codegen_flags: <defaults>
</compile_context>

<pallas_src>
import jax
import jax.numpy as jnp
from jax.experimental import pallas as pl
from jax.experimental.pallas import tpu as pltpu


def _dma_copy_kernel(x_hbm_ref, o_hbm_ref, sem):
    # Whole-array HBM->HBM copy; the DMA engine does all the work, the
    # TensorCore only issues and waits on a single descriptor.
    cp = pltpu.make_async_copy(x_hbm_ref, o_hbm_ref, sem)
    cp.start()
    cp.wait()


def merge_temporal_dim(x_seq: jax.Array) -> jax.Array:
    """Flatten the leading (T, B) dims of x_seq into a single (T*B) dim,
    materializing a contiguous copy (PyTorch .flatten(0,1).contiguous())."""
    T, B = x_seq.shape[:2]
    rest = x_seq.shape[2:]
    out_shape = (T * B,) + rest

    # Metadata-only reshape (free on a contiguous array) so the DMA source and
    # destination refs have identical shapes.
    x_flat = jnp.reshape(x_seq, out_shape)

    itemsize = jnp.dtype(x_seq.dtype).itemsize
    nbytes = x_seq.size * itemsize

    return pl.pallas_call(
        _dma_copy_kernel,
        out_shape=jax.ShapeDtypeStruct(out_shape, x_seq.dtype),
        # Raw (un-tiled, un-staged) refs for both operands: the kernel body
        # performs the copy itself via the async-DMA descriptor above.
        in_specs=[pl.BlockSpec(memory_space=pl.ANY)],
        out_specs=pl.BlockSpec(memory_space=pl.ANY),
        scratch_shapes=[pltpu.SemaphoreType.DMA(())],
        # True (bandwidth-only) cost: one full read + one full write.
        cost_estimate=pl.CostEstimate(
            flops=0, transcendentals=0, bytes_accessed=2 * nbytes),
    )(x_flat)


if __name__ == "__main__":
    # Small deterministic example consistent with a spiking-net temporal input:
    # T=8 time steps, batch=2, channels=4, spatial 16x16 (NCHW).
    T, B, C, H, W = 8, 2, 4, 16, 16
    key = jax.random.PRNGKey(0)
    x_seq = jax.random.normal(key, (T, B, C, H, W), dtype=jnp.float32)

    out = merge_temporal_dim(x_seq)
    out = jax.block_until_ready(out)

    # Reference: pure-JAX reshape (same semantics as flatten(0,1).contiguous()).
    ref = jnp.reshape(x_seq, (T * B, C, H, W))

    assert out.shape == (T * B, C, H, W), out.shape
    assert out.dtype == x_seq.dtype
    assert bool(jnp.array_equal(out, ref))

    print("KERNEL_OK")
</pallas_src>

<mosaic_0001>
module attributes {stable_mosaic.version = 11 : i64} {
  func.func @_dma_copy_kernel(%arg0: memref<16x4x16x16xf32, #tpu.memory_space<any>>, %arg1: memref<16x4x16x16xf32, #tpu.memory_space<any>>, %arg2: memref<!tpu.dma_semaphore, #tpu.memory_space<semaphore_mem>>) attributes {dimension_semantics = [], scalar_prefetch = 0 : i64, scratch_operands = 1 : i64, tpu.core_type = #tpu.core_type<tc>} {
    tpu.enqueue_dma source(%arg0 : memref<16x4x16x16xf32, #tpu.memory_space<any>>) target(%arg1 : memref<16x4x16x16xf32, #tpu.memory_space<any>>) target_semaphore(%arg2 : memref<!tpu.dma_semaphore, #tpu.memory_space<semaphore_mem>>)
    tpu.wait_dma2 semaphore(%arg2 : memref<!tpu.dma_semaphore, #tpu.memory_space<semaphore_mem>>) src(%arg0 : memref<16x4x16x16xf32, #tpu.memory_space<any>>) dst(%arg1 : memref<16x4x16x16xf32, #tpu.memory_space<any>>)
    return
  }
}

</mosaic_0001>

<bundles_post_ra>
// kernel: tpu_custom_call.1
= control target key start
LH: loop header
LB: loop body
LE: loop exit
PB: predicated region body
PF: predicated region fallthrough
CT: control target
= control target key end

     0   :  { %s36_s6 = smov [#allocation2]   ;;  %s37_s7 = smov [#allocation3]   ;;  %s55_s0 = inlined_call_operand.hbm [shape: f32[16,4,16,16], index: 0, kind: input, shape index: {}]   ;;  %s56_s1 = inlined_call_operand.hbm [shape: f32[16,4,16,16], index: 1, kind: output, shape index: {}]  }
   0x1   :  { %s38_s8 = smov 0  }
   0x2   :  { %18 = dma.general %s55_s0, 16384, %s56_s1, %s36_s6, %s37_s7, [#allocation4], %s38_s8, 0  }
   0x3   :  { %34 = dma.done.wait [#allocation2], 16384 }
   0x4   :  { %35 = vsyncadd [#allocation2], 4294950912 }
   0x5   :  { %24 = vsyncmov [#allocation2] }
   0x8   :  { %s25_s13 = vpop.sfrf %24 }
   0x9   :  { %p30_p0 = scmp.ne.s32.totalorder %s25_s13, 0 }
   0xb   :  { %29 = shalt.err (%p30_p0)  }

</bundles_post_ra>
